<compile_context>
chip_gen: v7x
topology: tpu7x:2x2x1
jax: 0.10.0
libtpu: 0.0.40
codegen_flags: <defaults>
</compile_context>

<pallas_src>
import jax
import jax.numpy as jnp
from jax import lax
from jax.experimental import pallas as pl
from jax.experimental.pallas import tpu as pltpu


def _self_attn_kernel(q_ref, k_ref, v_ref, xq_ref, wo_ref, bo_ref, eb_ref, o_ref):
    """One (batch image, query-pixel tile) grid step.

    q_ref : (1, Cq, tq)   bf16  query tile (projection precomputed in wrapper)
    k_ref : (1, Cq, Npad) bf16  all keys of this image
    v_ref : (1, Cv, Npad) bf16  all values of this image
    xq_ref: (1, C,  tq)   f32   raw-x query tile (residual add)
    wo_ref: (C, Cv) bf16, bo_ref: (C, 1) f32, eb_ref: (1, Npad) f32 mask
    """
    f32 = jnp.float32
    q = q_ref[0]                       # (Cq, tq)
    k = k_ref[0]                       # (Cq, Npad)
    v = v_ref[0]                       # (Cv, Npad)

    c_tt = (((0,), (0,)), ((), ()))    # contract dim-0 of both: lhs^T @ rhs
    c_nt = (((1,), (1,)), ((), ()))    # contract dim-1 of both: lhs @ rhs^T

    # energy[n, m] = q[:, n] . k[:, m]   (contraction depth Cq = C//8)
    energy = lax.dot_general(q, k, c_tt, preferred_element_type=f32)        # (tq, Npad)
    energy = energy + eb_ref[...]      # additive mask: -1e30 on padded key columns

    # Row softmax over the key (lane) axis; f32 statistics, normalization deferred.
    e_max = jnp.max(energy, axis=-1, keepdims=True)
    p = jnp.exp(energy - e_max)                                             # (tq, Npad)
    inv_l = pl.reciprocal(jnp.sum(p, axis=-1, keepdims=True), approx=True)  # (tq, 1)

    # Unnormalized PV product, then scale the small (tq, Cv) result (no (tq, Npad)
    # attention slab is ever materialized in normalized form).
    pv = lax.dot_general(p.astype(jnp.bfloat16), v, c_nt,
                         preferred_element_type=f32)                        # (tq, Cv)
    pv = pv * inv_l                                                         # (tq, Cv)

    # 1x1 out conv + bias + residual (residual taken from the f32 x tile).
    y = lax.dot_general(wo_ref[...], pv.astype(jnp.bfloat16), c_nt,
                        preferred_element_type=f32) + bo_ref[...] + xq_ref[0]   # (C, tq)
    o_ref[0] = y.astype(o_ref.dtype)   # lane-dense store (tq on lanes)


def _round_up(x, m):
    return (x + m - 1) // m * m


def _vmem_capacity_bytes():
    try:
        return int(pltpu.get_tpu_info().vmem_capacity_bytes)
    except Exception:
        return 64 * 1024 * 1024        # conservative (v7x-sized) fallback


def _step_vmem_estimate(C, Cq, Cv, Npad, tq):
    """Rough per-step VMEM footprint in bytes."""
    bf16, f32 = 2, 4
    est = 0
    est += Cq * Npad * bf16                  # k block (single-buffered)
    est += Cv * Npad * bf16                  # v block (single-buffered)
    est += 2 * Cq * tq * bf16                # q tile (double-buffered)
    est += 2 * C * tq * f32                  # residual x tile (double-buffered)
    est += 2 * C * tq * f32                  # output tile (double-buffered)
    est += tq * Npad * (2 * f32 + bf16)      # energy / exp slab (+ bf16 copy)
    est += tq * Cv * (f32 + bf16) + C * tq * f32
    est += Npad * f32 + C * Cv * bf16 + C * f32
    est += 2 * 1024 * 1024                   # relayout / misc headroom
    return est


def _choose_query_tile(C, Cq, Cv, Npad, budget):
    cands = sorted({c for c in (Npad, 2048, 1024, 512, 256, 128)
                    if c <= Npad and Npad % c == 0 and (c == Npad or c % 128 == 0)},
                   reverse=True)
    for tq in cands:
        if _step_vmem_estimate(C, Cq, Cv, Npad, tq) <= budget:
            return tq
    return cands[-1]                    # 128 always divides Npad


def _spec(shape, index_map, *, single_buffer=False):
    """BlockSpec, optionally single-buffered for grid-invariant blocks."""
    if single_buffer:
        try:
            return pl.BlockSpec(shape, index_map, pipeline_mode=pl.Buffered(1))
        except Exception:
            pass                        # older API: fall back to default buffering
    return pl.BlockSpec(shape, index_map)


def self_attention_pallas(x_nchw, params, *, tq=None):
    """x_nchw: (B, C, H, W) float32.  Returns (B, C, H, W)."""
    B, C, H, W = x_nchw.shape
    N = H * W
    wq, bq, wk, bk, wv, bv, wo, bo = params
    Cq, Ck, Cv = wq.shape[0], wk.shape[0], wv.shape[0]
    assert Cq == Ck, "query/key channels must match for bmm"
    assert wo.shape == (C, Cv)

    Npad = _round_up(N, 128)
    capacity = _vmem_capacity_bytes()
    if tq is None:
        tq = _choose_query_tile(C, Cq, Cv, Npad, int(0.70 * capacity))
    assert Npad % tq == 0 and (tq == Npad or tq % 128 == 0), "bad query tile"
    nq = Npad // tq

    # NCHW -> (B, C, N): pure reshape, no HBM transpose.
    x_bcn = x_nchw.reshape(B, C, N)

    # 1x1-conv projections hoisted to the wrapper: O(N*C^2) once per image,
    # so the kernel's energy matmul contracts over Cq = C//8 only.
    q = jnp.einsum('oc,bcn->bon', wq, x_bcn) + bq[None, :, None]    # (B, Cq, N) f32
    k = jnp.einsum('oc,bcn->bon', wk, x_bcn) + bk[None, :, None]    # (B, Cq, N) f32
    v = jnp.einsum('oc,bcn->bon', wv, x_bcn) + bv[None, :, None]    # (B, Cv, N) f32

    pad = ((0, 0), (0, 0), (0, Npad - N))
    q_b = jnp.pad(q, pad).astype(jnp.bfloat16)
    k_b = jnp.pad(k, pad).astype(jnp.bfloat16)
    v_b = jnp.pad(v, pad).astype(jnp.bfloat16)
    x_p = jnp.pad(x_bcn, pad)                                       # f32 (residual)

    # Additive softmax mask: 0 on valid key columns, -1e30 on padded columns.
    ebias = jnp.where(jnp.arange(Npad) < N, 0.0, -1e30)
    ebias = ebias.astype(jnp.float32).reshape(1, Npad)

    wo_b = wo.astype(jnp.bfloat16)                                  # (C, Cv)
    bo_col = bo.reshape(C, 1).astype(jnp.float32)

    grid_spec = pltpu.PrefetchScalarGridSpec(
        num_scalar_prefetch=0,
        grid=(B, nq),
        in_specs=[
            _spec((1, Cq, tq), lambda b, qi: (b, 0, qi)),                       # q tile
            _spec((1, Cq, Npad), lambda b, qi: (b, 0, 0), single_buffer=True),  # k (per image)
            _spec((1, Cv, Npad), lambda b, qi: (b, 0, 0), single_buffer=True),  # v (per image)
            _spec((1, C, tq), lambda b, qi: (b, 0, qi)),                        # residual x tile
            _spec((C, Cv), lambda b, qi: (0, 0), single_buffer=True),           # Wo
            _spec((C, 1), lambda b, qi: (0, 0), single_buffer=True),            # bo
            _spec((1, Npad), lambda b, qi: (0, 0), single_buffer=True),         # softmax mask
        ],
        out_specs=pl.BlockSpec((1, C, tq), lambda b, qi: (b, 0, qi)),
    )

    est = _step_vmem_estimate(C, Cq, Cv, Npad, tq)
    vmem_limit = int(min(max(2 * est, 32 * 1024 * 1024), int(0.80 * capacity)))

    flops = B * (2 * Npad * Npad * (Cq + Cv) + 2 * Npad * C * Cv)
    bytes_accessed = (B * Npad * (4 * Cq + 2 * Cv + 8 * C)
                      + Npad * 4 + C * Cv * 2 + C * 4)
    cost = pl.CostEstimate(flops=int(flops),
                           transcendentals=int(B * Npad * Npad),
                           bytes_accessed=int(bytes_accessed))

    out_pad = pl.pallas_call(
        _self_attn_kernel,
        out_shape=jax.ShapeDtypeStruct((B, C, Npad), x_bcn.dtype),
        grid_spec=grid_spec,
        compiler_params=pltpu.CompilerParams(
            dimension_semantics=("parallel", "parallel"),
            vmem_limit_bytes=vmem_limit),
        cost_estimate=cost,
    )(q_b, k_b, v_b, x_p, wo_b, bo_col, ebias)

    return out_pad[:, :, :N].reshape(B, C, H, W)


def init_params(key, in_channels):
    """Deterministic parameter init matching nn.Conv2d(kernel_size=1) shapes."""
    qc = in_channels // 8
    kc = in_channels // 8
    vc = in_channels
    ks = jax.random.split(key, 8)

    def conv_init(kw, kb, c_out, c_in):
        bound = 1.0 / jnp.sqrt(jnp.float32(c_in))
        w = jax.random.uniform(kw, (c_out, c_in), jnp.float32, -bound, bound)
        b = jax.random.uniform(kb, (c_out,), jnp.float32, -bound, bound)
        return w, b

    wq, bq = conv_init(ks[0], ks[1], qc, in_channels)
    wk, bk = conv_init(ks[2], ks[3], kc, in_channels)
    wv, bv = conv_init(ks[4], ks[5], vc, in_channels)
    wo, bo = conv_init(ks[6], ks[7], in_channels, vc)
    return (wq, bq, wk, bk, wv, bv, wo, bo)


def self_attention_ref(x_nchw, params):
    """Pure-JAX f32 reference reproducing the PyTorch forward exactly."""
    B, C, H, W = x_nchw.shape
    N = H * W
    wq, bq, wk, bk, wv, bv, wo, bo = params
    xf = x_nchw.reshape(B, C, N)                                    # (B, C, N)
    q = jnp.einsum('oc,bcn->bon', wq, xf) + bq[None, :, None]       # (B, Cq, N)
    k = jnp.einsum('oc,bcn->bon', wk, xf) + bk[None, :, None]       # (B, Ck, N)
    v = jnp.einsum('oc,bcn->bon', wv, xf) + bv[None, :, None]       # (B, Cv, N)
    energy = jnp.einsum('bqn,bqm->bnm', q, k)                       # (B, N, N)
    att = jax.nn.softmax(energy, axis=-1)
    out = jnp.einsum('bcm,bnm->bcn', v, att)                        # (B, Cv, N)
    out = jnp.einsum('oc,bcn->bon', wo, out) + bo[None, :, None]    # (B, C, N)
    return (out + xf).reshape(B, C, H, W)


if __name__ == "__main__":
    key = jax.random.PRNGKey(0)
    k_x1, k_p1, k_x2, k_x3, k_p3 = jax.random.split(key, 5)

    tol = dict(atol=5e-2, rtol=5e-2)   # bf16 MXU operands + approx reciprocal

    # Case 1: in_channels=16 -> Cq=Ck=2, Cv=16.  N=64 < 128 exercises padding+mask.
    B, C, H, W = 2, 16, 8, 8
    x = jax.random.normal(k_x1, (B, C, H, W), jnp.float32)
    params = init_params(k_p1, C)
    y = jax.block_until_ready(self_attention_pallas(x, params))
    y_ref = self_attention_ref(x, params)
    assert y.shape == (B, C, H, W)
    assert jnp.allclose(y, y_ref, **tol), "mismatch vs reference (small, padded)"

    # Case 2: N = 256 with forced tq=128 -> grid (1, 2), exercises query tiling.
    x2 = jax.random.normal(k_x2, (1, C, 16, 16), jnp.float32)
    y2 = jax.block_until_ready(self_attention_pallas(x2, params, tq=128))
    y2_ref = self_attention_ref(x2, params)
    assert jnp.allclose(y2, y2_ref, **tol), "mismatch vs reference (tiled)"

    # Case 3: N = 144 (not 128-divisible) with tq=128 -> padding + tiling + mask.
    C3 = 32
    params3 = init_params(k_p3, C3)
    x3 = jax.random.normal(k_x3, (1, C3, 12, 12), jnp.float32)
    y3 = jax.block_until_ready(self_attention_pallas(x3, params3, tq=128))
    y3_ref = self_attention_ref(x3, params3)
    assert jnp.allclose(y3, y3_ref, **tol), "mismatch vs reference (padded+tiled)"

    print("KERNEL_OK")
</pallas_src>

<mosaic_0001>
module attributes {stable_mosaic.version = 11 : i64} {
  func.func @_self_attn_kernel(%arg0: i32, %arg1: i32, %arg2: memref<1x2x128xbf16, #tpu.memory_space<vmem>>, %arg3: memref<1x2x128xbf16, #tpu.memory_space<vmem>>, %arg4: memref<1x16x128xbf16, #tpu.memory_space<vmem>>, %arg5: memref<1x16x128xf32, #tpu.memory_space<vmem>>, %arg6: memref<16x16xbf16, #tpu.memory_space<vmem>>, %arg7: memref<16x1xf32, #tpu.memory_space<vmem>>, %arg8: memref<1x128xf32, #tpu.memory_space<vmem>>, %arg9: memref<1x16x128xf32, #tpu.memory_space<vmem>>) attributes {dimension_semantics = [#tpu.dimension_semantics<parallel>, #tpu.dimension_semantics<parallel>], iteration_bounds = array<i64: 2, 1>, scalar_prefetch = 0 : i64, scratch_operands = 0 : i64, tpu.core_type = #tpu.core_type<tc>, window_params = [{transform_indices = @transform_0, window_bounds = array<i64: 1, 2, 128>}, {pipeline_mode = #tpu.pipeline_mode<synchronous>, transform_indices = @transform_1, window_bounds = array<i64: 1, 2, 128>}, {pipeline_mode = #tpu.pipeline_mode<synchronous>, transform_indices = @transform_2, window_bounds = array<i64: 1, 16, 128>}, {transform_indices = @transform_3, window_bounds = array<i64: 1, 16, 128>}, {pipeline_mode = #tpu.pipeline_mode<synchronous>, transform_indices = @transform_4, window_bounds = array<i64: 16, 16>}, {pipeline_mode = #tpu.pipeline_mode<synchronous>, transform_indices = @transform_5, window_bounds = array<i64: 16, 1>}, {pipeline_mode = #tpu.pipeline_mode<synchronous>, transform_indices = @transform_6, window_bounds = array<i64: 1, 128>}, {transform_indices = @transform_7, window_bounds = array<i64: 1, 16, 128>}]} {
    %c0 = arith.constant 0 : index
    %c0_0 = arith.constant 0 : index
    %c0_1 = arith.constant 0 : index
    %0 = vector.load %arg2[%c0, %c0_0, %c0_1] : memref<1x2x128xbf16, #tpu.memory_space<vmem>>, vector<1x2x128xbf16>
    %1 = vector.shape_cast %0 : vector<1x2x128xbf16> to vector<2x128xbf16>
    %c0_2 = arith.constant 0 : index
    %c0_3 = arith.constant 0 : index
    %c0_4 = arith.constant 0 : index
    %2 = vector.load %arg3[%c0_2, %c0_3, %c0_4] : memref<1x2x128xbf16, #tpu.memory_space<vmem>>, vector<1x2x128xbf16>
    %3 = vector.shape_cast %2 : vector<1x2x128xbf16> to vector<2x128xbf16>
    %c0_5 = arith.constant 0 : index
    %c0_6 = arith.constant 0 : index
    %c0_7 = arith.constant 0 : index
    %4 = vector.load %arg4[%c0_5, %c0_6, %c0_7] : memref<1x16x128xbf16, #tpu.memory_space<vmem>>, vector<1x16x128xbf16>
    %5 = vector.shape_cast %4 : vector<1x16x128xbf16> to vector<16x128xbf16>
    %cst = arith.constant dense<0.000000e+00> : vector<128x128xf32>
    %6 = tpu.matmul %1, %3, %cst {dimension_numbers = #tpu.dot_dimension_numbers<[0], [0], [1], [1], [0, 1, 1, 1], [], []>} : vector<2x128xbf16>, vector<2x128xbf16>, vector<128x128xf32> -> vector<128x128xf32>
    %c0_8 = arith.constant 0 : index
    %c0_9 = arith.constant 0 : index
    %7 = vector.load %arg8[%c0_8, %c0_9] : memref<1x128xf32, #tpu.memory_space<vmem>>, vector<1x128xf32>
    %8 = vector.broadcast %7 : vector<1x128xf32> to vector<128x128xf32>
    %9 = arith.addf %6, %8 : vector<128x128xf32>
    %cst_10 = arith.constant dense<0xFF800000> : vector<128xf32>
    %10 = vector.multi_reduction <maximumf>, %9, %cst_10 [1] : vector<128x128xf32> to vector<128xf32>
    %11 = vector.shape_cast %10 : vector<128xf32> to vector<128x1xf32>
    %12 = vector.broadcast %11 : vector<128x1xf32> to vector<128x128xf32>
    %13 = arith.subf %9, %12 : vector<128x128xf32>
    %14 = math.exp %13 : vector<128x128xf32>
    %cst_11 = arith.constant dense<0.000000e+00> : vector<128xf32>
    %15 = vector.multi_reduction <add>, %14, %cst_11 [1] : vector<128x128xf32> to vector<128xf32>
    %16 = vector.shape_cast %15 : vector<128xf32> to vector<128x1xf32>
    %17 = tpu.reciprocal %16 {approx = true} : vector<128x1xf32> -> vector<128x1xf32>
    %18 = arith.truncf %14 : vector<128x128xf32> to vector<128x128xbf16>
    %cst_12 = arith.constant dense<0.000000e+00> : vector<128x16xf32>
    %19 = tpu.matmul %18, %5, %cst_12 {dimension_numbers = #tpu.dot_dimension_numbers<[1], [1], [0], [0], [0, 0, 1, 0], [], []>} : vector<128x128xbf16>, vector<16x128xbf16>, vector<128x16xf32> -> vector<128x16xf32>
    %20 = vector.broadcast %17 : vector<128x1xf32> to vector<128x16xf32>
    %21 = arith.mulf %19, %20 : vector<128x16xf32>
    %c0_13 = arith.constant 0 : index
    %c0_14 = arith.constant 0 : index
    %22 = vector.load %arg6[%c0_13, %c0_14] : memref<16x16xbf16, #tpu.memory_space<vmem>>, vector<16x16xbf16>
    %23 = arith.truncf %21 : vector<128x16xf32> to vector<128x16xbf16>
    %cst_15 = arith.constant dense<0.000000e+00> : vector<16x128xf32>
    %24 = tpu.matmul %22, %23, %cst_15 {dimension_numbers = #tpu.dot_dimension_numbers<[1], [1], [0], [0], [0, 0, 1, 0], [], []>} : vector<16x16xbf16>, vector<128x16xbf16>, vector<16x128xf32> -> vector<16x128xf32>
    %c0_16 = arith.constant 0 : index
    %c0_17 = arith.constant 0 : index
    %25 = vector.load %arg7[%c0_16, %c0_17] : memref<16x1xf32, #tpu.memory_space<vmem>>, vector<16x1xf32>
    %26 = vector.broadcast %25 : vector<16x1xf32> to vector<16x128xf32>
    %27 = arith.addf %24, %26 : vector<16x128xf32>
    %c0_18 = arith.constant 0 : index
    %c0_19 = arith.constant 0 : index
    %c0_20 = arith.constant 0 : index
    %28 = vector.load %arg5[%c0_18, %c0_19, %c0_20] : memref<1x16x128xf32, #tpu.memory_space<vmem>>, vector<1x16x128xf32>
    %29 = vector.shape_cast %28 : vector<1x16x128xf32> to vector<16x128xf32>
    %30 = arith.addf %27, %29 : vector<16x128xf32>
    %c0_21 = arith.constant 0 : index
    %c0_22 = arith.constant 0 : index
    %c0_23 = arith.constant 0 : index
    %31 = vector.load %arg9[%c0_21, %c0_22, %c0_23] : memref<1x16x128xf32, #tpu.memory_space<vmem>>, vector<1x16x128xf32>
    %32 = vector.shape_cast %31 : vector<1x16x128xf32> to vector<16x128xf32>
    %33 = vector.shape_cast %30 : vector<16x128xf32> to vector<1x16x128xf32>
    tpu.vector_store %arg9[%c0_21, %c0_22, %c0_23], %33 {strides = array<i32>} : memref<1x16x128xf32, #tpu.memory_space<vmem>>, vector<1x16x128xf32>,
    return
  }
  func.func @transform_0(%arg0: i32, %arg1: i32) -> (i32, i32, i32) {
    %c0_i32 = arith.constant 0 : i32
    %c0_i32_0 = arith.constant 0 : i32
    return %arg0, %c0_i32, %arg1 : i32, i32, i32
  }
  func.func @transform_1(%arg0: i32, %arg1: i32) -> (i32, i32, i32) {
    %c0_i32 = arith.constant 0 : i32
    %c0_i32_0 = arith.constant 0 : i32
    %c0_i32_1 = arith.constant 0 : i32
    return %arg0, %c0_i32, %c0_i32_0 : i32, i32, i32
  }
  func.func @transform_2(%arg0: i32, %arg1: i32) -> (i32, i32, i32) {
    %c0_i32 = arith.constant 0 : i32
    %c0_i32_0 = arith.constant 0 : i32
    %c0_i32_1 = arith.constant 0 : i32
    return %arg0, %c0_i32, %c0_i32_0 : i32, i32, i32
  }
  func.func @transform_3(%arg0: i32, %arg1: i32) -> (i32, i32, i32) {
    %c0_i32 = arith.constant 0 : i32
    %c0_i32_0 = arith.constant 0 : i32
    return %arg0, %c0_i32, %arg1 : i32, i32, i32
  }
  func.func @transform_4(%arg0: i32, %arg1: i32) -> (i32, i32) {
    %c0_i32 = arith.constant 0 : i32
    %c0_i32_0 = arith.constant 0 : i32
    %c0_i32_1 = arith.constant 0 : i32
    return %c0_i32, %c0_i32_0 : i32, i32
  }
  func.func @transform_5(%arg0: i32, %arg1: i32) -> (i32, i32) {
    %c0_i32 = arith.constant 0 : i32
    %c0_i32_0 = arith.constant 0 : i32
    %c0_i32_1 = arith.constant 0 : i32
    return %c0_i32, %c0_i32_0 : i32, i32
  }
  func.func @transform_6(%arg0: i32, %arg1: i32) -> (i32, i32) {
    %c0_i32 = arith.constant 0 : i32
    %c0_i32_0 = arith.constant 0 : i32
    %c0_i32_1 = arith.constant 0 : i32
    return %c0_i32, %c0_i32_0 : i32, i32
  }
  func.func @transform_7(%arg0: i32, %arg1: i32) -> (i32, i32, i32) {
    %c0_i32 = arith.constant 0 : i32
    %c0_i32_0 = arith.constant 0 : i32
    return %arg0, %c0_i32, %arg1 : i32, i32, i32
  }
}

</mosaic_0001>

<bundles_post_ra>
// kernel: tpu_custom_call.1
= control target key start
LH: loop header
LB: loop body
LE: loop exit
PB: predicated region body
PF: predicated region fallthrough
CT: control target
= control target key end

     0   :  { %12 = vsyncpa [#allocation3], 0  ;;  %s1818_s0 = inlined_call_operand.vmem [shape: bf16[2,2,128], index: 0, kind: input, shape index: {}]   ;;  %s1819_s1 = inlined_call_operand.hbm [shape: bf16[2,2,128], index: 1, kind: input, shape index: {}]   ;;  %s1820_s2 = inlined_call_operand.vmem [shape: bf16[2,16,128], index: 2, kind: input, shape index: {}]   ;;  %s1821_s3 = inlined_call_operand.hbm [shape: f32[2,16,128], index: 3, kind: input, shape index: {}]   ;;  %s1822_s4 = inlined_call_operand.vmem [shape: bf16[16,16], index: 4, kind: input, shape index: {}]   ;;  %s1823_s5 = inlined_call_operand.vmem [shape: f32[16,1], index: 5, kind: input, shape index: {}]   ;;  %s1824_s6 = inlined_call_operand.vmem [shape: f32[1,128], index: 6, kind: input, shape index: {}]   ;;  %s1825_s7 = inlined_call_operand.hbm [shape: f32[2,16,128], index: 7, kind: output, shape index: {}]  }
   0x1   :  { %13 = vsyncpa [#allocation6], 0 }
   0x2   :  { %15 = vsyncpa [#allocation6 + $0x1], 0 }
   0x3   :  { %16 = vsyncpa [#allocation4], 0 }
   0x4   :  { %18 = vsyncpa [#allocation4 + $0x1], 0  ;;  %s1490_s24 = smov 0   ;;  %s1492_s25 = smov 0  }
   0x5   :  { %s1494_s26 = smov 0   ;;  %s1496_s27 = smov 0  }
   0x6   :  { %s1498_s28 = smov 0   ;;  %s1500_s29 = smov 0  }
   0x7 LB: > { %s1031_s30 = sadd.s32 4294967295, %s1438_s29   ;;  %s1032_s8 = sadd.s32 4294967294, %s1438_s29   ;;  %s1438_s29 = sphi %s1500_s29, %s24_s29   ;;  %s1434_s28 = sphi %s1498_s28, %s1850_s28   ;;  %s1430_s27 = sphi %s1496_s27, %s1849_s27   ;;  %s1426_s26 = sphi %s1494_s26, %s1848_s26   ;;  %s1422_s25 = sphi %s1492_s25, %s1847_s25   ;;  %s1418_s24 = sphi %s1490_s24, %s1846_s24  }
   0x8   : > { %p84_p0 = scmp.ne.s32.totalorder %s1422_s25, %s1418_s24  ;;  %p85_p1 = scmp.eq.s32.totalorder %s1031_s30, 0 }
   0x9   : > { %p132_p2 = scmp.ne.s32.totalorder %s1426_s26, %s1422_s25  ;;  %p133_p3 = scmp.eq.s32.totalorder %s1438_s29, 0 }
   0xa   : > { %p227_p4 = scmp.eq.s32.totalorder %s1031_s30, 1  ;;  %p1528_p5 = por %p85_p1, %p84_p0 }
   0xb   : > { %p233_p6 = scmp.eq.s32.totalorder %s1032_s8, 1  ;;  %p1532_p7 = por %p133_p3, %p132_p2 }
   0xc   : > { %s1831_s10 = scalar_select %p1528_p5, 1, 0 }
   0xd   : > { %p1536_p8 = por %p227_p4, %p132_p2  ;;  %p1540_p9 = por %p233_p6, %p84_p0 }
   0xe   : > { %p1033_p10 = scmp.ge.s32.totalorder %s1438_s29, 1  ;;  %p240_p11 = scmp.lt.s32.totalorder %s1438_s29, 3 }
   0xf   : > { %s1833_s12 = scalar_select %p1536_p8, 1, 0 }
  0x10   : > { %s1834_s13 = scalar_select %p1540_p9, 1, 0 }
  0x11   : > { %s1034_s14 = sshll.u32 %s1430_s27, 4  ;;  %p1552_p12 = pnand %p1033_p10, %p240_p11 }
  0x12   : > { %s1550_s17 = scalar_lea.hbm %s1819_s1, %s1034_s14  ;;  %s1440_s19 = smov [#allocation2]  }
  0x13   : > { %s1835_s18 = scalar_select %p1552_p12, 1, 0 }
  0x14   : > { %s255_s20 = sshll.u32 %s1440_s19, 4  ;;  %p1154_p0 = pneg %p1552_p12  ;;  %s1556_s20 = int_to_ptr.vmem [resolvable:$true] %s255_s20 }
  0x15   : > { %p1166_p1 = scmp.lt.s32.totalorder %s1438_s29, 2  ;;  %s292_s21 = sand.u32 1, %s1426_s26  }
  0x16   : > { %p1565_p2 = pnand %p1154_p0, %p1528_p5  ;;  %s1292_s30 = scalar_lea.hbm %s1550_s17, 16 }
  0x17   : > { %p1571_p3 = pnand %p1166_p1, %p1532_p7  ;;  %p1293_p4 = scmp.ne.s32.totalorder %s1550_s17, %s1292_s30 }
  0x18   : > { %p1294_p6 = pneg %p1565_p2  ;;  %s1297_s15 = scalar_lea.hbm %s1819_s1, 32 }
  0x19   : > { %s1837_s23 = scalar_select %p1571_p3, 1, 0 }
  0x1a   : > { %p1295_p10 = pnand %p1294_p6, %p1293_p4  ;;  %p1298_p0 = scmp.lt.u32.totalorder %s1550_s17, %s1819_s1 }
  0x1b   : > { %p1299_p7 = scmp.lt.u32.totalorder %s1297_s15, %s1292_s30  ;;  %p1301_p13 = scmp.lt.u32.totalorder %s1292_s30, %s1550_s17 }
  0x1c   : > { %p1296_p11 = pneg %p1295_p10 }
  0x1d   : > { %p1300_p1 = por %p1299_p7, %p1298_p0 }
  0x1f   : > { %p1302_p9 = por %p1301_p13, %p1300_p1 }
  0x21   : > { %p1303_p8 = pnand %p1302_p9, %p1296_p11 }
  0x23   : > { %1306 = shalt.err (!%p1303_p8)
}
  0x24   : > { %s1307_s19 = scalar_lea.vmem %s1556_s20, 16  ;;  %s1314_s8 = scalar_lea.vmem %s1556_s20, 32 }
  0x25   : > { %p1308_p4 = scmp.ne.s32.totalorder %s1556_s20, %s1307_s19  ;;  %p1315_p12 = scmp.lt.s32.totalorder %s1556_s20, %s1556_s20 }
  0x26   : > { %p1316_p3 = scmp.lt.s32.totalorder %s1314_s8, %s1307_s19 }
  0x27   : > { %p1310_p10 = pnand %p1308_p4, %p1294_p6 }
  0x28   : > { %p1317_p0 = por %p1316_p3, %p1315_p12 }
  0x29   : > { %p1311_p5 = pneg %p1310_p10 }
  0x2b   : > { %p1318_p7 = pnand %p1317_p0, %p1311_p5 }
  0x2d   : > { %1321 = shalt.err (!%p1318_p7)
}
  0x2e   : > { %1157 = dma.hbm_to_vmem [thread:$0]  (!%p1565_p2), %s1550_s17, 16, %s1556_s20, [#allocation3]  }
  0x2f   : > { %s36_s30 = sadd.s32 1, %s1434_s28  ;;  %s1036_s14 = sshll.u32 %s292_s21, 4 }
  0x30   : > { %p38_p8 = scmp.ge.s32.totalorder %s36_s30, 2  ;;  %s1061_s15 = sshll.u32 %s1434_s28, 8 }
  0x31   : > { %s296_s16 = scalar_lea.vmem [#allocation5], %s1036_s14  ;;  %s1611_s8 = scalar_lea.hbm %s1821_s3, %s1061_s15 }
  0x32   : > { %s304_s11 = sshll.u32 %s296_s16, 4  ;;  %s1852_s30 = smov (%p38_p8, %s36_s30), 0  ;;  %s1613_s11 = int_to_ptr.vmem [resolvable:$true] %s304_s11 }
  0x33   : > { %s68_s17 = ssub.s32 %s1434_s28, %s1852_s30  ;;  %s1623_s14 = scalar_lea.sflag [#allocation6], %s292_s21 }
  0x34   : > { %p1617_p5 = scmp.eq.s32.totalorder %s68_s17, 0  ;;  %s1322_s16 = scalar_lea.hbm %s1611_s8, 256 }
  0x35   : > { %p1323_p9 = scmp.ne.s32.totalorder %s1611_s8, %s1322_s16  ;;  %p1839_p12 = scmp.ne.s32.totalorder %s1837_s23, 0 }
  0x36   : > { %s1327_s19 = scalar_lea.hbm %s1821_s3, 512  ;;  %p1328_p6 = scmp.lt.u32.totalorder %s1611_s8, %s1821_s3 }
  0x37   : > { %p1324_p13 = pneg %p1839_p12  ;;  %p1329_p11 = scmp.lt.u32.totalorder %s1327_s19, %s1322_s16 }
  0x38   : > { %p1331_p4 = scmp.lt.u32.totalorder %s1322_s16, %s1611_s8 }
  0x39   : > { %p1325_p2 = pnand %p1324_p13, %p1323_p9  ;;  %p1330_p1 = por %p1329_p11, %p1328_p6 }
  0x3b   : > { %p1326_p3 = pneg %p1325_p2  ;;  %p1332_p10 = por %p1331_p4, %p1330_p1 }
  0x3d   : > { %p1333_p0 = pnand %p1332_p10, %p1326_p3 }
  0x3f   : > { %1336 = shalt.err (!%p1333_p0)
}
  0x40   : > { %s1337_s21 = scalar_lea.vmem %s1613_s11, 256  ;;  %s1441_s15 = smov [#allocation5]  }
  0x41   : > { %p1338_p7 = scmp.ne.s32.totalorder %s1613_s11, %s1337_s21  ;;  %s1342_s22 = sshll.u32 %s1441_s15, 4  ;;  %s1343_s22 = int_to_ptr.vmem [resolvable:$false] %s1342_s22 }
  0x42   : > { %s1344_s9 = scalar_lea.vmem %s1343_s22, 512  ;;  %p1345_p2 = scmp.lt.s32.totalorder %s1613_s11, %s1343_s22 }
  0x43   : > { %p1340_p8 = pnand %p1338_p7, %p1324_p13  ;;  %p1346_p6 = scmp.lt.s32.totalorder %s1344_s9, %s1337_s21 }
  0x45   : > { %p1341_p9 = pneg %p1340_p8  ;;  %p1347_p11 = por %p1346_p6, %p1345_p2 }
  0x47   : > { %p1348_p1 = pnand %p1347_p11, %p1341_p9 }
  0x49   : > { %1351 = shalt.err (!%p1348_p1)
}
  0x4a   : > { %s1442_s16 = smov 128   ;;  %s1443_s19 = smov 8  }
  0x4b   : > { %1161 = dma.hbm_to_vmem [thread:$0]  (!%p1839_p12), %s1611_s8, 256, %s1613_s11, %s1623_s14, %s1442_s16, %s1442_s16, %s1443_s19  }
  0x4c   : > { %s1840_s17 = sadd.s32 1, %s1426_s26  ;;  %p1841_p13 = scmp.ne.s32.totalorder %s1835_s18, 0 }
  0x4d   : > { %s1656_s15 = scalar_select %p1617_p5, %s1426_s26, %s1840_s17  }
  0x4e   : > { %316 = sbr.rel (%p1841_p13) target bundleno = 1100 (0x44c), region = 48  ;;  %p1842_p3 = scmp.ne.s32.totalorder (!%p1841_p13), %s1831_s10, 0 }
  0x55   : > { %1405 = dma.done.wait (%p1842_p3), [#allocation3], 16  }
  0x56   : > { %1407 = vsyncadd (%p1842_p3), [#allocation3], 4294967280  ;;  %s1665_s21 = sand.u32 1, %s1422_s25  }
  0x57   : > { %s1040_s23 = sshll.u32 %s1665_s21, 4  ;;  %s323_s11 = scalar_lea.sflag [#allocation6], %s1665_s21 }
  0x58   : > { %s1671_s8 = scalar_lea.vmem [#allocation5], %s1040_s23 }
  0x59   : > { %1409 = dma.done.wait (%p1842_p3), %s323_s11, 256  }
  0x5a   : > { %1411 = vsyncadd (%p1842_p3), %s323_s11, 4294967040  ;;  %p368_p5 = scmp.lt.s32.totalorder %s1430_s27, 1  ;;  %vm432_vm0 = vcmask 1040384   ;;  %v381_v1 = vld [vmem:[#allocation2] sm:$0x1]  ;;  %vm407_vm1 = vcmask 15360  }
  0x5b   : > { %1147 = vmatprep.subr.msk.bf16.mxu1 %vm432_vm0, %v381_v1  ;;  %v434_v2 = vsel %vm432_vm0, %v381_v1, 0  ;;  %v1044_v12 = vld [vmem:[%s1824_s6] ss:$0 sm:$0xff]  ;;  %vm1445_vm2 = vmmov 0   ;;  %vm815_vm3 = vcmask 130048   ;;  %s367_s19 = scalar_lea.vmem [#allocation7], %s1040_s23 }
  0x5c   : > { %s369_s18 = scalar_select %p368_p5, %s1430_s27, 1  ;;  %1092 = vmatpush3.bf16.msra.mxu1 %v434_v2 }
  0x5d   : > { %s1063_s10 = sshll.u32 %s1430_s27, 8  ;;  %s891_s20 = scalar_lea.sflag [#allocation4], %s1665_s21 }
  0x5e   : > { %s373_s22 = scalar_lea.vmem %s1818_s0, %s369_s18  ;;  %s1062_s9 = sshll.u32 %s369_s18, 3 }
  0x5f   : > { %s378_s17 = scalar_lea.vmem %s1820_s2, %s1062_s9  ;;  %v380_v0 = vld [vmem:[%s373_s22] sm:$0x1]  ;;  %s1769_s23 = scalar_lea.hbm %s1825_s7, %s1063_s10 }
  0x60   : > { %391 = vxpose.xlu0.c.b16.start.end [1/1] (short) %v380_v0, 128  ;;  %v1226_v11 = vld [vmem:[%s378_s17] sm:$0xff]   ;;  %s905_s17 = sshll.u32 %s367_s19, 4  ;;  %p1843_p4 = scmp.ne.s32.totalorder %s1833_s12, 0  ;;  %s1764_s17 = int_to_ptr.vmem [resolvable:$true] %s905_s17 }
  0x61   : > { %1109 = vmatprep.subr.bf16.mxu1 %v1226_v11  ;;  %s1352_s27 = scalar_lea.vmem %s1764_s17, 256 }
  0x62   : > { %p1353_p12 = scmp.ne.s32.totalorder %s1764_s17, %s1352_s27 }
  0x64   : > { %p1354_p10 = pnand %p1353_p12, %p1843_p4 }
  0x66   : > { %p1355_p0 = pneg %p1354_p10 }
  0xc6   : > { %v399_v3 = vpop.trf.xlu0 }
  0xc7   : > { %1093 = vmatprep.mubr.msk.bf16.mxu1 %vm407_vm1, %v399_v3 }
  0xca   : > { %v400_v4 = vpop.trf.xlu0 }
  0xcb   : > { %1094 = vmatmul.mubr.msk.bf16.vlgmr.msra.gmra.mrb[0].mxu1 %vm407_vm1, %v400_v4 }
  0xcc   : > { %1110 = vmatpush3.bf16.xpose.msra.mxu1 %v1226_v11 }
  0xce   : > { %v401_v5 = vpop.trf.xlu0 }
  0xcf   : > { %1097 = vmatprep.mubr.msk.bf16.mxu1 %vm407_vm1, %v401_v5 }
  0xd2   : > { %v402_v6 = vpop.trf.xlu0 }
  0xd3   : > { %1098 = vmatmul.mubr.msk.bf16.gmra.mrb[4].mxu1 %vm407_vm1, %v402_v6 }
  0xd6   : > { %v403_v7 = vpop.trf.xlu0 }
  0xd7   : > { %1101 = vmatprep.mubr.msk.bf16.mxu1 %vm407_vm1, %v403_v7 }
  0xda   : > { %v404_v8 = vpop.trf.xlu0 }
  0xdb   : > { %1102 = vmatmul.mubr.msk.bf16.gmra.mrb[8].mxu1 %vm407_vm1, %v404_v8 }
  0xde   : > { %v405_v9 = vpop.trf.xlu0 }
  0xdf   : > { %1105 = vmatprep.mubr.msk.bf16.mxu1 %vm407_vm1, %v405_v9 }
  0xe2   : > { %v406_v10 = vpop.trf.xlu0 }
  0xe3   : > { %1106 = vmatmul.mubr.msk.bf16.gmra.mrb[12].mxu1 %vm407_vm1, %v406_v10 }
 0x19e   : > { %v1095_v13 = vpop.f32.mrb[0].mxu1 }
 0x19f   : > { %v479_v14 = vadd.f32 %v1095_v13, %v1044_v12  ;;  %v470_v15 = vpop.f32.mrb[1].mxu1 }
 0x1a0   : > { %v471_v16 = vadd.f32 %v1044_v12, %v470_v15  ;;  %v1096_v17 = vpop.f32.mrb[2].mxu1 }
 0x1a1   : > { %537 = vmax.xlane.f32.xlu1 %v479_v14  ;;  %v473_v18 = vpop.f32.mrb[3].mxu1  ;;  %v482_v21 = vadd.f32 %v1096_v17, %v1044_v12 }
 0x1a2   : > { %v474_v19 = vadd.f32 %v1044_v12, %v473_v18  ;;  %533 = vmax.xlane.f32.xlu0 %v471_v16 }
 0x1a5   : > { %535 = vmax.xlane.f32.xlu1 %v474_v19 }
 0x1a6   : > { %v1099_v20 = vpop.f32.mrb[4].mxu1 }
 0x1a7   : > { %v486_v22 = vpop.f32.mrb[5].mxu1  ;;  %v495_v24 = vadd.f32 %v1099_v20, %v1044_v12 }
 0x1a8   : > { %v1100_v23 = vpop.f32.mrb[6].mxu1  ;;  %v487_v27 = vadd.f32 %v1044_v12, %v486_v22 }
 0x1a9   : > { %539 = vmax.xlane.f32.xlu1 %v482_v21  ;;  %v489_v25 = vpop.f32.mrb[7].mxu1  ;;  %v1696_v33 = vadd.f32 %v1100_v23, %v1044_v12 }
 0x1aa   : > { %v490_v31 = vadd.f32 %v1044_v12, %v489_v25 }
 0x1ad   : > { %545 = vmax.xlane.f32.xlu1 %v495_v24 }
 0x1ae   : > { %v1103_v26 = vpop.f32.mrb[8].mxu1 }
 0x1af   : > { %v502_v28 = vpop.f32.mrb[9].mxu1  ;;  %v1698_v36 = vadd.f32 %v1103_v26, %v1044_v12 }
 0x1b0   : > { %v1104_v29 = vpop.f32.mrb[10].mxu1  ;;  %v1707_v40 = vadd.f32 %v1044_v12, %v502_v28 }
 0x1b1   : > { %541 = vmax.xlane.f32.xlu1 %v487_v27  ;;  %v505_v30 = vpop.f32.mrb[11].mxu1  ;;  %v1714_v42 = vadd.f32 %v1104_v29, %v1044_v12 }
 0x1b2   : > { %v1711_v41 = vadd.f32 %v1044_v12, %v505_v30 }
 0x1b5   : > { %543 = vmax.xlane.f32.xlu1 %v490_v31 }
 0x1b6   : > { %v1107_v32 = vpop.f32.mrb[12].mxu1 }
 0x1b7   : > { %v518_v34 = vpop.f32.mrb[13].mxu1  ;;  %v1719_v44 = vadd.f32 %v1107_v32, %v1044_v12 }
 0x1b8   : > { %v1108_v35 = vpop.f32.mrb[14].mxu1  ;;  %v1716_v43 = vadd.f32 %v1044_v12, %v518_v34 }
 0x1b9   : > { %547 = vmax.xlane.f32.xlu1 %v1696_v33  ;;  %v521_v37 = vpop.f32.mrb[15].mxu1  ;;  %v1703_v39 = vadd.f32 %v1108_v35, %v1044_v12 }
 0x1ba   : > { %v1701_v38 = vadd.f32 %v1044_v12, %v521_v37 }
 0x1bc   : > { %559 = vmax.xlane.f32.xlu0 %v1701_v38 }
 0x1bd   : > { %553 = vmax.xlane.f32.xlu1 %v1698_v36 }
 0x1c0   : > { %563 = vmax.xlane.f32.xlu0 %v1703_v39 }
 0x1c1   : > { %549 = vmax.xlane.f32.xlu1 %v1707_v40 }
 0x1c5   : > { %551 = vmax.xlane.f32.xlu1 %v1711_v41 }
 0x1c9   : > { %555 = vmax.xlane.f32.xlu1 %v1714_v42 }
 0x1cd   : > { %557 = vmax.xlane.f32.xlu1 %v1716_v43 }
 0x1d1   : > { %561 = vmax.xlane.f32.xlu1 %v1719_v44 }
 0x22e   : > { %v538_v45 = vpop.xlane.xlu1 %537 }
 0x22f   : > { %v534_v46 = vpop.xlane.xlu0 %533  ;;  %v567_v47 = vsub.f32 %v479_v14, %v538_v45 }
 0x230   : > { %v565_v48 = vsub.f32 %v471_v16, %v534_v46 }
 0x231   : > { %v585_v52 = vmul.f32 1.442695, %v567_v47 }
 0x232   : > { %v581_v49 = vmul.f32 1.442695, %v565_v48  ;;  %v536_v50 = vpop.xlane.xlu1 %535 }
 0x233   : > { %v566_v51 = vsub.f32 %v474_v19, %v536_v50 }
 0x234   : > { %1228 = vpow2.f32 %v581_v49 }
 0x235   : > { %v583_v53 = vmul.f32 1.442695, %v566_v51 }
 0x236   : > { %v540_v54 = vpop.xlane.xlu1 %539 }
 0x237   : > { %1230 = vpow2.f32 %v583_v53  ;;  %v568_v55 = vsub.f32 %v482_v21, %v540_v54  ;;  %v1444_v53 = vmov 0.0   ;;  %v798_v54 = vld [vmem:[%s1823_s5] sm:$0xff] }
 0x238   : > { %1232 = vpow2.f32 %v585_v52  ;;  %1127 = vmatprep.subr.bf16.mxu0 %v1444_v53  ;;  %1143 = vmatprep.mubr.msk.bf16.mxu0 %vm1445_vm2, %v1444_v53 }
 0x239   : > { %v587_v56 = vmul.f32 1.442695, %v568_v55  ;;  %v799_v55 = vld [vmem:[%s1823_s5 + $0x8] sm:$0xff] }
 0x23a   : > { %v546_v57 = vpop.xlane.xlu1 %545 }
 0x23b   : > { %1234 = vpow2.f32 %v587_v56  ;;  %v571_v59 = vsub.f32 %v495_v24, %v546_v57  ;;  %v1446_v56 = vmov 0  }
 0x23c   : > { %1224 = vset.pattern.permute.xlu1 %v1446_v56  ;;  %1225 = vset.pattern.permute.xlu0 %v1446_v56 }
 0x23d   : > { %v593_v1 = vmul.f32 1.442695, %v571_v59 }
 0x23e   : > { %v1229_v58 = vpop.eup %1228  ;;  %v542_v60 = vpop.xlane.xlu1 %541 }
 0x23f   : > { %v569_v61 = vsub.f32 %v487_v27, %v542_v60  ;;  %613 = vadd.xlane.f32.xlu1 %v1229_v58 }
 0x241   : > { %v1231_v62 = vpop.eup %1230  ;;  %v589_v63 = vmul.f32 1.442695, %v569_v61 }
 0x242   : > { %v1233_v0 = vpop.eup %1232  ;;  %v544_v2 = vpop.xlane.xlu1 %543  ;;  %615 = vadd.xlane.f32.xlu0 %v1231_v62  ;;  %v661_v3 = vpack.c.bf16 %v1231_v62, %v1229_v58 }
 0x243   : > { %1236 = vpow2.f32 %v589_v63  ;;  %v570_v4 = vsub.f32 %v490_v31, %v544_v2  ;;  %617 = vadd.xlane.f32.xlu1 %v1233_v0 }
 0x244   : > { %1111 = vmatprep.mubr.bf16.mxu1 %v661_v3  ;;  %1238 = vpow2.f32 %v593_v1 }
 0x245   : > { %v1235_v5 = vpop.eup %1234  ;;  %v591_v6 = vmul.f32 1.442695, %v570_v4 }
 0x246   : > { %v548_v7 = vpop.xlane.xlu1 %547  ;;  %619 = vadd.xlane.f32.xlu0 %v1235_v5  ;;  %v662_v8 = vpack.c.bf16 %v1235_v5, %v1233_v0 }
 0x247   : > { %1240 = vpow2.f32 %v591_v6  ;;  %v572_v9 = vsub.f32 %v1696_v33, %v548_v7 }
 0x248   : > { %1112 = vmatmul.mubr.bf16.vlgmr.msra.gmra.mrb[16].mxu1 %v662_v8 }
 0x249   : > { %v595_v10 = vmul.f32 1.442695, %v572_v9  ;;  %v560_v18 = vpop.xlane.xlu0 %559 }
 0x24a   : > { %v554_v11 = vpop.xlane.xlu1 %553  ;;  %v578_v26 = vsub.f32 %v1701_v38, %v560_v18 }
 0x24b   : > { %1242 = vpow2.f32 %v595_v10  ;;  %v575_v13 = vsub.f32 %v1698_v36, %v554_v11 }
 0x24c   : > { %v607_v32 = vmul.f32 1.442695, %v578_v26 }
 0x24d   : > { %v1237_v12 = vpop.eup %1236  ;;  %v601_v20 = vmul.f32 1.442695, %v575_v13  ;;  %v564_v29 = vpop.xlane.xlu0 %563 }
 0x24e   : > { %v550_v14 = vpop.xlane.xlu1 %549  ;;  %621 = vadd.xlane.f32.xlu1 %v1237_v12  ;;  %v1239_v16 = vpop.eup %1238  ;;  %v580_v33 = vsub.f32 %v1703_v39, %v564_v29 }
 0x24f   : > { %v573_v15 = vsub.f32 %v1707_v40, %v550_v14 }
 0x250   : > { %v611_v38 = vmul.f32 1.442695, %v580_v33 }
 0x251   : > { %v1241_v17 = vpop.eup %1240  ;;  %v597_v19 = vmul.f32 1.442695, %v573_v15 }
 0x252   : > { %v552_v21 = vpop.xlane.xlu1 %551  ;;  %623 = vadd.xlane.f32.xlu0 %v1241_v17  ;;  %625 = vadd.xlane.f32.xlu1 %v1239_v16  ;;  %v663_v22 = vpack.c.bf16 %v1241_v17, %v1237_v12 }
 0x253   : > { %1244 = vpow2.f32 %v597_v19  ;;  %v574_v23 = vsub.f32 %v1711_v41, %v552_v21 }
 0x254   : > { %1115 = vmatprep.mubr.bf16.mxu1 %v663_v22  ;;  %1246 = vpow2.f32 %v601_v20 }
 0x255   : > { %v1243_v24 = vpop.eup %1242  ;;  %v599_v25 = vmul.f32 1.442695, %v574_v23 }
 0x256   : > { %v556_v27 = vpop.xlane.xlu1 %555  ;;  %627 = vadd.xlane.f32.xlu0 %v1243_v24  ;;  %v664_v28 = vpack.c.bf16 %v1243_v24, %v1239_v16 }
 0x257   : > { %1248 = vpow2.f32 %v599_v25  ;;  %v576_v30 = vsub.f32 %v1714_v42, %v556_v27 }
 0x258   : > { %1116 = vmatmul.mubr.bf16.gmra.mrb[20].mxu1 %v664_v28 }
 0x259   : > { %v603_v31 = vmul.f32 1.442695, %v576_v30 }
 0x25a   : > { %v558_v34 = vpop.xlane.xlu1 %557 }
 0x25b   : > { %1250 = vpow2.f32 %v603_v31  ;;  %v577_v35 = vsub.f32 %v1716_v43, %v558_v34 }
 0x25c   : > { %1252 = vpow2.f32 %v607_v32 }
 0x25d   : > { %v1245_v36 = vpop.eup %1244  ;;  %v605_v37 = vmul.f32 1.442695, %v577_v35 }
 0x25e   : > { %v562_v40 = vpop.xlane.xlu1 %561  ;;  %629 = vadd.xlane.f32.xlu1 %v1245_v36  ;;  %v1247_v45 = vpop.eup %1246 }
 0x25f   : > { %1254 = vpow2.f32 %v605_v37  ;;  %v579_v41 = vsub.f32 %v1719_v44, %v562_v40 }
 0x260   : > { %1256 = vpow2.f32 %v611_v38 }
 0x261   : > { %v1249_v42 = vpop.eup %1248  ;;  %v609_v46 = vmul.f32 1.442695, %v579_v41 }
 0x262   : > { %631 = vadd.xlane.f32.xlu0 %v1249_v42  ;;  %633 = vadd.xlane.f32.xlu1 %v1247_v45  ;;  %v665_v39 = vpack.c.bf16 %v1249_v42, %v1245_v36 }
 0x263   : > { %1258 = vpow2.f32 %v609_v46 }
 0x264   : > { %1119 = vmatprep.mubr.bf16.mxu1 %v665_v39 }
 0x265   : > { %v1251_v47 = vpop.eup %1250 }
 0x266   : > { %635 = vadd.xlane.f32.xlu0 %v1251_v47  ;;  %v666_v43 = vpack.c.bf16 %v1251_v47, %v1247_v45  ;;  %v1253_v48 = vpop.eup %1252 }
 0x268   : > { %1120 = vmatmul.mubr.bf16.gmra.mrb[24].mxu1 %v666_v43 }
 0x269   : > { %v1255_v49 = vpop.eup %1254 }
 0x26a   : > { %637 = vadd.xlane.f32.xlu1 %v1255_v49  ;;  %639 = vadd.xlane.f32.xlu0 %v1253_v48  ;;  %v667_v50 = vpack.c.bf16 %v1253_v48, %v1255_v49  ;;  %v1257_v51 = vpop.eup %1256 }
 0x26c   : > { %1123 = vmatprep.mubr.bf16.mxu1 %v667_v50 }
 0x26d   : > { %v1259_v44 = vpop.eup %1258 }
 0x26e   : > { %641 = vadd.xlane.f32.xlu1 %v1259_v44  ;;  %643 = vadd.xlane.f32.xlu0 %v1257_v51  ;;  %v668_v52 = vpack.c.bf16 %v1257_v51, %v1259_v44 }
 0x270   : > { %1124 = vmatmul.mubr.bf16.gmra.mrb[28].mxu1 %v668_v52 }
 0x27f   : > { %802 = vperm.xlu1 %1224, %v798_v54  }
 0x284   : > { %807 = vperm.xlu0 %1225, %v799_v55  }
 0x2cc   : > { %v614_v57 = vpop.xlane.xlu1 %613 }
 0x2cd   : > { %1260 = vrcp.f32 %v614_v57 }
 0x2cf   : > { %v616_v58 = vpop.xlane.xlu0 %615 }
 0x2d0   : > { %v618_v59 = vpop.xlane.xlu1 %617 }
 0x2d1   : > { %1262 = vrcp.f32 %v618_v59 }
 0x2d3   : > { %v620_v60 = vpop.xlane.xlu0 %619 }
 0x2d4   : > { %1264 = vrcp.f32 %v620_v60 }
 0x2d5   : > { %1266 = vrcp.f32 %v616_v58 }
 0x2d7   : > { %v1261_v63 = vpop.eup %1260 }
 0x2db   : > { %v622_v61 = vpop.xlane.xlu1 %621  ;;  %v1263_v1 = vpop.eup %1262 }
 0x2dc   : > { %1268 = vrcp.f32 %v622_v61 }
 0x2de   : > { %v1265_v3 = vpop.eup %1264 }
 0x2df   : > { %v624_v62 = vpop.xlane.xlu0 %623  ;;  %v1267_v5 = vpop.eup %1266 }
 0x2e0   : > { %v626_v9 = vpop.xlane.xlu1 %625 }
 0x2e1   : > { %1270 = vrcp.f32 %v626_v9 }
 0x2e3   : > { %v628_v12 = vpop.xlane.xlu0 %627 }
 0x2e4   : > { %1272 = vrcp.f32 %v628_v12 }
 0x2e5   : > { %1274 = vrcp.f32 %v624_v62 }
 0x2e6   : > { %v1269_v18 = vpop.eup %1268 }
 0x2eb   : > { %v630_v17 = vpop.xlane.xlu1 %629  ;;  %v1271_v21 = vpop.eup %1270 }
 0x2ec   : > { %1276 = vrcp.f32 %v630_v17  ;;  %v885_v17 = vld [vmem:[%s1671_s8 + $0x8] sm:$0xff] }
 0x2ee   : > { %v1273_v24 = vpop.eup %1272 }
 0x2ef   : > { %v632_v16 = vpop.xlane.xlu0 %631  ;;  %v634_v25 = vpop.xlane.xlu1 %633 }
 0x2f0   : > { %v1275_v27 = vpop.eup %1274  ;;  %1278 = vrcp.f32 %v634_v25 }
 0x2f3   : > { %v636_v22 = vpop.xlane.xlu0 %635 }
 0x2f4   : > { %1280 = vrcp.f32 %v636_v22 }
 0x2f5   : > { %1282 = vrcp.f32 %v632_v16 }
 0x2f6   : > { %v1277_v41 = vpop.eup %1276 }
 0x2f7   : > { %v638_v34 = vpop.xlane.xlu1 %637  ;;  %v640_v36 = vpop.xlane.xlu0 %639 }
 0x2f8   : > { %1284 = vrcp.f32 %v638_v34 }
 0x2fa   : > { %v1279_v46 = vpop.eup %1278 }
 0x2fb   : > { %v642_v38 = vpop.xlane.xlu1 %641  ;;  %v644_v40 = vpop.xlane.xlu0 %643 }
 0x2fc   : > { %1286 = vrcp.f32 %v642_v38 }
 0x2fd   : > { %1288 = vrcp.f32 %v644_v40 }
 0x2fe   : > { %1290 = vrcp.f32 %v640_v36  ;;  %v1281_v47 = vpop.eup %1280 }
 0x2ff   : > { %v1283_v48 = vpop.eup %1282 }
 0x302   : > { %v1285_v56 = vpop.eup %1284 }
 0x306   : > { %v1287_v59 = vpop.eup %1286 }
 0x307   : > { %v1289_v61 = vpop.eup %1288 }
 0x31b   : > { %v1113_v0 = vpop.f32.mrb[16].mxu1 }
 0x31c   : > { %v709_v2 = vpop.f32.mrb[17].mxu1  ;;  %v774_v6 = vmul.f32 %v1263_v1, %v1113_v0 }
 0x31d   : > { %v1114_v4 = vpop.f32.mrb[18].mxu1  ;;  %v772_v10 = vmul.f32 %v1261_v63, %v709_v2  ;;  %v1291_v63 = vpop.eup %1290 }
 0x31e   : > { %v775_v7 = vmul.f32 %v1265_v3, %v1114_v4  ;;  %v712_v8 = vpop.f32.mrb[19].mxu1 }
 0x31f   : > { %v773_v11 = vmul.f32 %v1267_v5, %v712_v8 }
 0x320   : > { %v791_v13 = vpack.c.bf16 %v775_v7, %v774_v6 }
 0x321   : > { %v790_v14 = vpack.c.bf16 %v773_v11, %v772_v10  ;;  %v1227_v10 = vld [vmem:[%s1822_s4] sm:$0xff]   ;;  %v803_v11 = vpop.permute.xlu1 %802 }
 0x322   : > { %v823_v20 = vsel %vm815_vm3, %v791_v13, 0  ;;  %v884_v13 = vld [vmem:[%s1671_s8] sm:$0xff]  ;;  %s1447_s8 = smov [#allocation7]  }
 0x323   : > { %v820_v15 = vsel %vm815_vm3, %v790_v14, 0  ;;  %v808_v14 = vpop.permute.xlu0 %807  ;;  %s1356_s14 = sshll.u32 %s1447_s8, 4  ;;  %s1357_s14 = int_to_ptr.vmem [resolvable:$false] %s1356_s14 }
 0x324   : > { %1128 = vmatpush3.bf16.xpose.msra.mxu0 %v820_v15  ;;  %s1358_s22 = scalar_lea.vmem %s1357_s14, 512  ;;  %p1359_p7 = scmp.lt.s32.totalorder %s1764_s17, %s1357_s14 }
 0x325   : > { %1129 = vmatprep.subr.bf16.mxu0 %v1444_v53  ;;  %p1360_p8 = scmp.lt.s32.totalorder %s1358_s22, %s1352_s27 }
 0x327   : > { %p1361_p9 = por %p1360_p8, %p1359_p7 }
 0x329   : > { %p1362_p2 = pnand %p1361_p9, %p1355_p0 }
 0x32b   : > { %v1117_v19 = vpop.f32.mrb[20].mxu1 }
 0x32c   : > { %v725_v23 = vpop.f32.mrb[21].mxu1  ;;  %1130 = vmatpush3.bf16.xpose.msra.mxu0 %v823_v20  ;;  %v778_v28 = vmul.f32 %v1271_v21, %v1117_v19 }
 0x32d   : > { %v1118_v26 = vpop.f32.mrb[22].mxu1  ;;  %1131 = vmatprep.subr.bf16.mxu0 %v1444_v53  ;;  %v776_v31 = vmul.f32 %v1269_v18, %v725_v23 }
 0x32e   : > { %v779_v29 = vmul.f32 %v1273_v24, %v1118_v26  ;;  %v728_v30 = vpop.f32.mrb[23].mxu1 }
 0x32f   : > { %v777_v32 = vmul.f32 %v1275_v27, %v728_v30 }
 0x330   : > { %v793_v33 = vpack.c.bf16 %v779_v29, %v778_v28 }
 0x331   : > { %v792_v35 = vpack.c.bf16 %v777_v32, %v776_v31 }
 0x332   : > { %v829_v42 = vsel %vm815_vm3, %v793_v33, 0 }
 0x333   : > { %v826_v37 = vsel %vm815_vm3, %v792_v35, 0 }
 0x334   : > { %1132 = vmatpush3.bf16.xpose.msra.mxu0 %v826_v37 }
 0x335   : > { %1133 = vmatprep.subr.bf16.mxu0 %v1444_v53 }
 0x33b   : > { %v1121_v45 = vpop.f32.mrb[24].mxu1 }
 0x33c   : > { %v741_v39 = vpop.f32.mrb[25].mxu1  ;;  %1134 = vmatpush3.bf16.xpose.msra.mxu0 %v829_v42  ;;  %v782_v49 = vmul.f32 %v1279_v46, %v1121_v45 }
 0x33d   : > { %v1122_v43 = vpop.f32.mrb[26].mxu1  ;;  %1135 = vmatprep.subr.bf16.mxu0 %v1444_v53  ;;  %v780_v44 = vmul.f32 %v1277_v41, %v741_v39 }
 0x33e   : > { %v783_v50 = vmul.f32 %v1281_v47, %v1122_v43  ;;  %v744_v51 = vpop.f32.mrb[27].mxu1 }
 0x33f   : > { %v781_v52 = vmul.f32 %v1283_v48, %v744_v51 }
 0x340   : > { %v795_v54 = vpack.c.bf16 %v783_v50, %v782_v49 }
 0x341   : > { %v794_v55 = vpack.c.bf16 %v781_v52, %v780_v44 }
 0x342   : > { %v835_v7 = vsel %vm815_vm3, %v795_v54, 0 }
 0x343   : > { %v1125_v57 = vpop.f32.mrb[28].mxu1  ;;  %v832_v58 = vsel %vm815_vm3, %v794_v55, 0 }
 0x344   : > { %v757_v60 = vpop.f32.mrb[29].mxu1  ;;  %1136 = vmatpush3.bf16.xpose.msra.mxu0 %v832_v58  ;;  %v786_v0 = vmul.f32 %v1287_v59, %v1125_v57 }
 0x345   : > { %v1126_v62 = vpop.f32.mrb[30].mxu1  ;;  %1137 = vmatprep.subr.bf16.mxu0 %v1444_v53  ;;  %v784_v3 = vmul.f32 %v1285_v56, %v757_v60 }
 0x346   : > { %v787_v1 = vmul.f32 %v1289_v61, %v1126_v62  ;;  %v760_v2 = vpop.f32.mrb[31].mxu1 }
 0x347   : > { %v785_v4 = vmul.f32 %v1291_v63, %v760_v2 }
 0x348   : > { %v797_v5 = vpack.c.bf16 %v787_v1, %v786_v0 }
 0x349   : > { %v796_v6 = vpack.c.bf16 %v785_v4, %v784_v3 }
 0x34a   : > { %v841_v9 = vsel %vm815_vm3, %v797_v5, 0 }
 0x34b   : > { %v838_v8 = vsel %vm815_vm3, %v796_v6, 0 }
 0x34c   : > { %1138 = vmatpush3.bf16.xpose.msra.mxu0 %v835_v7 }
 0x34d   : > { %1139 = vmatprep.subr.bf16.mxu0 %v1444_v53 }
 0x354   : > { %1140 = vmatpush3.bf16.xpose.msra.mxu0 %v838_v8 }
 0x355   : > { %1141 = vmatprep.subr.bf16.mxu0 %v1444_v53 }
 0x35c   : > { %1142 = vmatpush3.bf16.xpose.msra.mxu0 %v841_v9 }
 0x363   : > { %1144 = vmatmul.mubr.msk.bf16.vlgmr.msra.gmra.mrb[0].mxu0 %vm815_vm3, %v1227_v10 }
 0x436   : > { %v877_v12 = vpop.f32.mrb[0].mxu0 }
 0x437   : > { %v878_v15 = vadd.f32 %v877_v12, %v803_v11  ;;  %v1145_v53 = vpop.f32.mrb[1].mxu0 }
 0x438   : > { %v880_v16 = vpop.f32.mrb[2].mxu0 }
 0x439   : > { %v886_v18 = vadd.f32 %v884_v13, %v878_v15  ;;  %v881_v19 = vadd.f32 %v880_v16, %v808_v14  ;;  %v1146_v20 = vpop.f32.mrb[3].mxu0 }
 0x43b   : > { %888 = vst [vmem:[%s367_s19] sm:$0xff] %v886_v18  ;;  %v887_v21 = vadd.f32 %v885_v17, %v881_v19 }
 0x43d   : > { %889 = vst [vmem:[%s367_s19 + $0x8] sm:$0xff] %v887_v21 }
 0x43e   : > { %1365 = shalt.err (!%p1362_p2)
}
 0x43f   : > { %s1366_s9 = scalar_lea.hbm %s1769_s23, 256  ;;  %s1370_s10 = scalar_lea.hbm %s1825_s7, 512 }
 0x440   : > { %p1367_p6 = scmp.ne.s32.totalorder %s1769_s23, %s1366_s9  ;;  %p1371_p13 = scmp.lt.u32.totalorder %s1769_s23, %s1825_s7 }
 0x441   : > { %p1372_p3 = scmp.lt.u32.totalorder %s1370_s10, %s1366_s9  ;;  %p1374_p12 = scmp.lt.u32.totalorder %s1366_s9, %s1769_s23 }
 0x442   : > { %p1368_p11 = pnand %p1367_p6, %p1843_p4 }
 0x443   : > { %p1373_p5 = por %p1372_p3, %p1371_p13 }
 0x444   : > { %p1369_p1 = pneg %p1368_p11 }
 0x445   : > { %p1375_p10 = por %p1374_p12, %p1373_p5 }
 0x447   : > { %p1376_p0 = pnand %p1375_p10, %p1369_p1 }
 0x449   : > { %1379 = shalt.err (!%p1376_p0)
}
 0x44a   : > { %s1448_s27 = smov 128   ;;  %s1449_s8 = smov 8  }
 0x44b   : > { %1152 = dma.vmem_to_hbm [thread:$0]  (%p1843_p4), %s1764_s17, 256, %s1769_s23, %s891_s20, %s1448_s27, %s1448_s27, %s1449_s8  }
 0x44c PF: > { %s920_s14 = sand.u32 1, %s1418_s24   ;;  %p1844_p7 = scmp.ne.s32.totalorder %s1834_s13, 0 }
 0x44d   : > { %p1845_p8 = scmp.ge.s32.totalorder %s1438_s29, 2  ;;  %s921_s22 = scalar_lea.sflag [#allocation4], %s920_s14 }
 0x44f   : > { %p1163_p9 = pnand %p1845_p8, %p1844_p7 }
 0x451   : > { %1413 = dma.done.wait (!%p1163_p9), %s921_s22, 256  }
 0x452   : > { %1415 = vsyncadd (!%p1163_p9), %s921_s22, 4294967040  ;;  %s24_s29 = sadd.s32 1, %s1438_s29   ;;  %s1846_s24 = smov %s1422_s25 }
 0x453   : > { %p21_p2 = scmp.ge.s32.totalorder %s24_s29, 4   ;;  %s1847_s25 = smov %s1426_s26 }
 0x454   : > { %s1848_s26 = smov %s1656_s15  ;;  %s1849_s27 = smov %s1434_s28 }
 0x455   : > { %s1850_s28 = smov %s1852_s30  ;;  %23 = sbr.rel (!%p21_p2) target bundleno = 7 (0x7), region = 105 }
 0x45c   :  { %926 = vsyncpa [#allocation3], 1 }
 0x45d   :  { %928 = vsyncpa [#allocation3 + $0x1], 1 }
 0x45e   :  { %929 = vsyncpa [#allocation6], 1 }
 0x45f   :  { %931 = vsyncpa [#allocation6 + $0x1], 1 }
 0x460   :  { %932 = vsyncpa [#allocation4], 1 }
 0x461   :  { %934 = vsyncpa [#allocation4 + $0x1], 1 }

</bundles_post_ra>
